<compile_context>
chip_gen: v6e
topology: v6e:2x2x1
jax: 0.10.0
libtpu: 0.0.40
codegen_flags: <defaults>
</compile_context>

<pallas_src>
import jax
import jax.numpy as jnp
from jax import lax
from jax.experimental import pallas as pl
from jax.experimental.pallas import tpu as pltpu
import numpy as np

LANE = 128
SUBLANE = 8


def _round_up(x, m):
    return ((x + m - 1) // m) * m


def _make_char_rnn_kernel(T, B, H):
    """T, B, H are static (B already padded to a sublane multiple)."""

    def kernel(ids_ref, table_ref, whh_ref, wfc_ref, bfc_ref, out_ref, gx_ref):
        # ids_ref:   (T*B, 1) i32  time-major, batch-padded token ids
        # table_ref: (V, Gp)  f32  fused gate table: emb @ W_ih^T + (b_ih + b_hh),
        #                          tight gate layout [i|f|g|o] (each H lanes), padded cols zero
        # whh_ref:   (H, Gp)  bf16/f32  hidden->hidden, same tight gate layout
        # wfc_ref:   (H, Op)  bf16/f32  final linear (transposed, zero-padded)
        # bfc_ref:   (1, Op)  f32
        # out_ref:   (B, Op)  f32  logits for the last timestep (lane-dense)
        # gx_ref:    (T*B, Gp) f32 VMEM scratch for the hoisted input projection
        V, Gp = table_ref.shape

        # Exact one-hot built in VMEM on the VPU (no (B,T,V) HBM traffic).
        ids = ids_ref[...]                                               # (T*B, 1)
        onehot = (ids == lax.broadcasted_iota(jnp.int32, (T * B, V), 1)
                  ).astype(table_ref.dtype)                              # (T*B, V)

        # Time-parallel input projection (bias already folded into the table),
        # hoisted out of the recurrence and staged in VMEM scratch.
        gx_ref[...] = jnp.dot(onehot, table_ref[...],
                              preferred_element_type=jnp.float32)        # (T*B, Gp)

        whh = whh_ref[...]                                               # (H, Gp)
        w_dt = whh.dtype

        h = jnp.zeros((B, H), jnp.float32)
        c = jnp.zeros((B, H), jnp.float32)

        # Fully unrolled recurrence: per step one tiny MXU op (h @ W_hh over the
        # tight Gp-lane gate block) + one sigmoid over the block + one tanh on the
        # g slice.  T is small and static, so the Python unroll is fine.
        # TODO(synk): switch to lax.fori_loop(..., unroll=True) over gx_ref if T grows past ~16.
        for t in range(T):
            gates = gx_ref[pl.ds(t * B, B), :] + jnp.dot(
                h.astype(w_dt), whh, preferred_element_type=jnp.float32)  # (B, Gp)
            sig = jax.nn.sigmoid(gates)            # one EUP op over the tight block
            i_g = sig[:, 0 * H:1 * H]
            f_g = sig[:, 1 * H:2 * H]
            o_g = sig[:, 3 * H:4 * H]
            g_g = jnp.tanh(gates[:, 2 * H:3 * H])
            c = f_g * c + i_g * g_g
            h = o_g * jnp.tanh(c)

        # Lane-dense epilogue (Op is a multiple of 128 -> unmasked stores).
        out_ref[...] = (jnp.dot(h.astype(wfc_ref.dtype), wfc_ref[...],
                                preferred_element_type=jnp.float32)
                        + bfc_ref[...])

    return kernel


def init_torch_params(key, input_size, hidden_size, output_size):
    """Raw parameters with the exact nn.Embedding / nn.LSTM / nn.Linear shapes."""
    ks = jax.random.split(key, 7)
    H = hidden_size
    bound = 1.0 / np.sqrt(H)
    return {
        "emb":  jax.random.normal(ks[0], (input_size, H), jnp.float32),
        "w_ih": jax.random.uniform(ks[1], (4 * H, H), jnp.float32, -bound, bound),
        "w_hh": jax.random.uniform(ks[2], (4 * H, H), jnp.float32, -bound, bound),
        "b_ih": jax.random.uniform(ks[3], (4 * H,), jnp.float32, -bound, bound),
        "b_hh": jax.random.uniform(ks[4], (4 * H,), jnp.float32, -bound, bound),
        "w_fc": jax.random.uniform(ks[5], (output_size, H), jnp.float32, -bound, bound),
        "b_fc": jax.random.uniform(ks[6], (output_size,), jnp.float32, -bound, bound),
    }


def pack_params(p, weight_dtype=jnp.bfloat16):
    """Fuse embedding + input projection + bias into one table and pack matmul weights.

    Layout: gates packed tightly as [i|f|g|o], each H columns wide, padded up to a
    128-lane multiple with zeros (zero padding is load-bearing: it keeps the padded
    lanes inert through the recurrence and the final matmul).

    weight_dtype=jnp.bfloat16 (default) is MXU-native on v5e/v6e/v7x and halves the
    remaining weight DMA; matmuls accumulate in f32 either way.  The gate table stays
    f32 so the folded biases keep f32 precision (it is only V*Gp*4 bytes).
    """
    V, H = p["emb"].shape
    O = p["w_fc"].shape[0]
    G = 4 * H
    Gp = _round_up(G, LANE)
    Op = _round_up(O, LANE)

    emb = p["emb"].astype(jnp.float32)
    w_ih = p["w_ih"].astype(jnp.float32)                       # (4H, H), gate order [i,f,g,o]
    bias = (p["b_ih"] + p["b_hh"]).astype(jnp.float32)         # (4H,)

    # Fused, bias-folded gate table: row v = emb[v] @ W_ih^T + (b_ih + b_hh).
    # Exact because every (in-range) one-hot row sums to 1.
    table = emb @ w_ih.T + bias[None, :]                       # (V, 4H)
    gate_table = jnp.zeros((V, Gp), jnp.float32).at[:, :G].set(table)

    whh = jnp.zeros((H, Gp), weight_dtype).at[:, :G].set(
        p["w_hh"].T.astype(weight_dtype))                      # (H, 4H) tight gate columns
    wfc = jnp.zeros((H, Op), weight_dtype).at[:, :O].set(
        p["w_fc"].T.astype(weight_dtype))
    bfc = jnp.zeros((1, Op), jnp.float32).at[0, :O].set(p["b_fc"].astype(jnp.float32))

    return gate_table, whh, wfc, bfc


def char_rnn_forward(x_ids, packed, output_size):
    """x_ids: (B, T) int32 token ids. Returns (B, output_size) float32."""
    gate_table, whh, wfc, bfc = packed
    B, T = x_ids.shape
    H, Gp = whh.shape
    Op = wfc.shape[1]
    Bp = _round_up(max(B, SUBLANE), SUBLANE)

    # Time-major, batch-padded ids flattened to (T*Bp, 1): the only per-call input.
    ids = jnp.zeros((T, Bp), jnp.int32).at[:, :B].set(
        x_ids.T.astype(jnp.int32)).reshape(T * Bp, 1)

    vmem = pltpu.MemorySpace.VMEM
    out_p = pl.pallas_call(
        _make_char_rnn_kernel(T, Bp, H),
        out_shape=jax.ShapeDtypeStruct((Bp, Op), jnp.float32),
        in_specs=[pl.BlockSpec(memory_space=vmem)] * 5,   # 5 operands -> 5 specs
        out_specs=pl.BlockSpec(memory_space=vmem),
        scratch_shapes=[pltpu.VMEM((T * Bp, Gp), jnp.float32)],
    )(ids, gate_table, whh, wfc, bfc)
    # TODO(synk): when Bp >= 16, add a batch grid axis with
    # dimension_semantics=("parallel",) to shard across the two v7x TensorCores.
    return out_p[:B, :output_size]


def reference_forward(x_ids, p):
    """Pure-JAX f32 reference reproducing the PyTorch forward semantics exactly."""
    emb = p["emb"]
    H = emb.shape[1]
    w_ih, w_hh = p["w_ih"], p["w_hh"]
    b = p["b_ih"] + p["b_hh"]
    x = emb[x_ids]                                   # (B, T, H)
    B, T, _ = x.shape
    h = jnp.zeros((B, H), jnp.float32)
    c = jnp.zeros((B, H), jnp.float32)
    for t in range(T):
        gates = x[:, t, :] @ w_ih.T + h @ w_hh.T + b
        i_g = jax.nn.sigmoid(gates[:, 0 * H:1 * H])
        f_g = jax.nn.sigmoid(gates[:, 1 * H:2 * H])
        g_g = jnp.tanh(gates[:, 2 * H:3 * H])
        o_g = jax.nn.sigmoid(gates[:, 3 * H:4 * H])
        c = f_g * c + i_g * g_g
        h = o_g * jnp.tanh(c)
    return h @ p["w_fc"].T + p["b_fc"]


if __name__ == "__main__":
    input_size = 16      # vocab
    hidden_size = 32
    output_size = 16
    batch, seq = 2, 8

    key = jax.random.PRNGKey(0)
    k_params, k_x = jax.random.split(key)
    raw_params = init_torch_params(k_params, input_size, hidden_size, output_size)
    x_ids = jax.random.randint(k_x, (batch, seq), 0, input_size, dtype=jnp.int32)

    ref = reference_forward(x_ids, raw_params)

    # 1) Exactness check of kernel math/layout with f32 weights (tight tolerance).
    out_f32 = jax.block_until_ready(
        char_rnn_forward(x_ids, pack_params(raw_params, weight_dtype=jnp.float32),
                         output_size))
    np.testing.assert_allclose(np.asarray(out_f32), np.asarray(ref),
                               rtol=5e-5, atol=5e-5)

    # 2) Performance config: bf16 MXU weights (default) — tolerance loosened for
    #    bf16 rounding of W_hh / W_fc / per-step h cast.
    out_bf16 = jax.block_until_ready(
        char_rnn_forward(x_ids, pack_params(raw_params), output_size))
    np.testing.assert_allclose(np.asarray(out_bf16), np.asarray(ref),
                               rtol=3e-2, atol=3e-2)

    print("KERNEL_OK")
</pallas_src>

<mosaic_0001>
module attributes {stable_mosaic.version = 11 : i64} {
  func.func @kernel(%arg0: memref<64x1xi32, #tpu.memory_space<vmem>>, %arg1: memref<16x128xf32, #tpu.memory_space<vmem>>, %arg2: memref<32x128xf32, #tpu.memory_space<vmem>>, %arg3: memref<32x128xf32, #tpu.memory_space<vmem>>, %arg4: memref<1x128xf32, #tpu.memory_space<vmem>>, %arg5: memref<8x128xf32, #tpu.memory_space<vmem>>, %arg6: memref<64x128xf32, #tpu.memory_space<vmem>>) attributes {dimension_semantics = [], scalar_prefetch = 0 : i64, scratch_operands = 1 : i64, tpu.core_type = #tpu.core_type<tc>} {
    %c0 = arith.constant 0 : index
    %c0_0 = arith.constant 0 : index
    %0 = vector.load %arg0[%c0, %c0_0] : memref<64x1xi32, #tpu.memory_space<vmem>>, vector<64x1xi32>
    %1 = tpu.iota {dimensions = array<i32: 1>} : vector<64x16xi32>
    %2 = vector.broadcast %0 : vector<64x1xi32> to vector<64x16xi32>
    %3 = arith.cmpi eq, %2, %1 : vector<64x16xi32>
    %4 = arith.extui %3 : vector<64x16xi1> to vector<64x16xi32>
    %5 = arith.sitofp %4 : vector<64x16xi32> to vector<64x16xf32>
    %c0_1 = arith.constant 0 : index
    %c0_2 = arith.constant 0 : index
    %6 = vector.load %arg1[%c0_1, %c0_2] : memref<16x128xf32, #tpu.memory_space<vmem>>, vector<16x128xf32>
    %cst = arith.constant dense<0.000000e+00> : vector<64x128xf32>
    %7 = tpu.matmul %5, %6, %cst {dimension_numbers = #tpu.dot_dimension_numbers<[1], [0], [0], [1], [0, 0, 1, 1], [], []>} : vector<64x16xf32>, vector<16x128xf32>, vector<64x128xf32> -> vector<64x128xf32>
    %c0_3 = arith.constant 0 : index
    %c0_4 = arith.constant 0 : index
    %8 = vector.load %arg6[%c0_3, %c0_4] : memref<64x128xf32, #tpu.memory_space<vmem>>, vector<64x128xf32>
    tpu.vector_store %arg6[%c0_3, %c0_4], %7 {strides = array<i32>} : memref<64x128xf32, #tpu.memory_space<vmem>>, vector<64x128xf32>,
    %c0_5 = arith.constant 0 : index
    %c0_6 = arith.constant 0 : index
    %9 = vector.load %arg2[%c0_5, %c0_6] : memref<32x128xf32, #tpu.memory_space<vmem>>, vector<32x128xf32>
    %cst_7 = arith.constant 0.000000e+00 : f32
    %10 = vector.broadcast %cst_7 : f32 to vector<8x32xf32>
    %cst_8 = arith.constant 0.000000e+00 : f32
    %11 = vector.broadcast %cst_8 : f32 to vector<8x32xf32>
    %c0_9 = arith.constant 0 : index
    %c0_10 = arith.constant 0 : index
    %12 = vector.load %arg6[%c0_9, %c0_10] : memref<64x128xf32, #tpu.memory_space<vmem>>, vector<8x128xf32>
    %cst_11 = arith.constant dense<0.000000e+00> : vector<8x128xf32>
    %13 = tpu.matmul %10, %9, %cst_11 {dimension_numbers = #tpu.dot_dimension_numbers<[1], [0], [0], [1], [0, 0, 1, 1], [], []>} : vector<8x32xf32>, vector<32x128xf32>, vector<8x128xf32> -> vector<8x128xf32>
    %14 = arith.addf %12, %13 : vector<8x128xf32>
    %15 = arith.negf %14 : vector<8x128xf32>
    %16 = math.exp %15 : vector<8x128xf32>
    %cst_12 = arith.constant 1.000000e+00 : f32
    %17 = vector.broadcast %cst_12 : f32 to vector<8x128xf32>
    %18 = arith.addf %17, %16 : vector<8x128xf32>
    %19 = arith.divf %17, %18 : vector<8x128xf32>
    %20 = vector.extract_strided_slice %19 {offsets = [0, 0], sizes = [8, 32], strides = [1, 1]} : vector<8x128xf32> to vector<8x32xf32>
    %21 = vector.extract_strided_slice %19 {offsets = [0, 32], sizes = [8, 32], strides = [1, 1]} : vector<8x128xf32> to vector<8x32xf32>
    %22 = vector.extract_strided_slice %19 {offsets = [0, 96], sizes = [8, 32], strides = [1, 1]} : vector<8x128xf32> to vector<8x32xf32>
    %23 = vector.extract_strided_slice %14 {offsets = [0, 64], sizes = [8, 32], strides = [1, 1]} : vector<8x128xf32> to vector<8x32xf32>
    %24 = math.tanh %23 : vector<8x32xf32>
    %25 = arith.mulf %21, %11 : vector<8x32xf32>
    %26 = arith.mulf %20, %24 : vector<8x32xf32>
    %27 = arith.addf %25, %26 : vector<8x32xf32>
    %28 = math.tanh %27 : vector<8x32xf32>
    %29 = arith.mulf %22, %28 : vector<8x32xf32>
    %c8 = arith.constant 8 : index
    %c0_13 = arith.constant 0 : index
    %30 = vector.load %arg6[%c8, %c0_13] : memref<64x128xf32, #tpu.memory_space<vmem>>, vector<8x128xf32>
    %cst_14 = arith.constant dense<0.000000e+00> : vector<8x128xf32>
    %31 = tpu.matmul %29, %9, %cst_14 {dimension_numbers = #tpu.dot_dimension_numbers<[1], [0], [0], [1], [0, 0, 1, 1], [], []>} : vector<8x32xf32>, vector<32x128xf32>, vector<8x128xf32> -> vector<8x128xf32>
    %32 = arith.addf %30, %31 : vector<8x128xf32>
    %33 = arith.negf %32 : vector<8x128xf32>
    %34 = math.exp %33 : vector<8x128xf32>
    %cst_15 = arith.constant 1.000000e+00 : f32
    %35 = vector.broadcast %cst_15 : f32 to vector<8x128xf32>
    %36 = arith.addf %35, %34 : vector<8x128xf32>
    %37 = arith.divf %35, %36 : vector<8x128xf32>
    %38 = vector.extract_strided_slice %37 {offsets = [0, 0], sizes = [8, 32], strides = [1, 1]} : vector<8x128xf32> to vector<8x32xf32>
    %39 = vector.extract_strided_slice %37 {offsets = [0, 32], sizes = [8, 32], strides = [1, 1]} : vector<8x128xf32> to vector<8x32xf32>
    %40 = vector.extract_strided_slice %37 {offsets = [0, 96], sizes = [8, 32], strides = [1, 1]} : vector<8x128xf32> to vector<8x32xf32>
    %41 = vector.extract_strided_slice %32 {offsets = [0, 64], sizes = [8, 32], strides = [1, 1]} : vector<8x128xf32> to vector<8x32xf32>
    %42 = math.tanh %41 : vector<8x32xf32>
    %43 = arith.mulf %39, %27 : vector<8x32xf32>
    %44 = arith.mulf %38, %42 : vector<8x32xf32>
    %45 = arith.addf %43, %44 : vector<8x32xf32>
    %46 = math.tanh %45 : vector<8x32xf32>
    %47 = arith.mulf %40, %46 : vector<8x32xf32>
    %c16 = arith.constant 16 : index
    %c0_16 = arith.constant 0 : index
    %48 = vector.load %arg6[%c16, %c0_16] : memref<64x128xf32, #tpu.memory_space<vmem>>, vector<8x128xf32>
    %cst_17 = arith.constant dense<0.000000e+00> : vector<8x128xf32>
    %49 = tpu.matmul %47, %9, %cst_17 {dimension_numbers = #tpu.dot_dimension_numbers<[1], [0], [0], [1], [0, 0, 1, 1], [], []>} : vector<8x32xf32>, vector<32x128xf32>, vector<8x128xf32> -> vector<8x128xf32>
    %50 = arith.addf %48, %49 : vector<8x128xf32>
    %51 = arith.negf %50 : vector<8x128xf32>
    %52 = math.exp %51 : vector<8x128xf32>
    %cst_18 = arith.constant 1.000000e+00 : f32
    %53 = vector.broadcast %cst_18 : f32 to vector<8x128xf32>
    %54 = arith.addf %53, %52 : vector<8x128xf32>
    %55 = arith.divf %53, %54 : vector<8x128xf32>
    %56 = vector.extract_strided_slice %55 {offsets = [0, 0], sizes = [8, 32], strides = [1, 1]} : vector<8x128xf32> to vector<8x32xf32>
    %57 = vector.extract_strided_slice %55 {offsets = [0, 32], sizes = [8, 32], strides = [1, 1]} : vector<8x128xf32> to vector<8x32xf32>
    %58 = vector.extract_strided_slice %55 {offsets = [0, 96], sizes = [8, 32], strides = [1, 1]} : vector<8x128xf32> to vector<8x32xf32>
    %59 = vector.extract_strided_slice %50 {offsets = [0, 64], sizes = [8, 32], strides = [1, 1]} : vector<8x128xf32> to vector<8x32xf32>
    %60 = math.tanh %59 : vector<8x32xf32>
    %61 = arith.mulf %57, %45 : vector<8x32xf32>
    %62 = arith.mulf %56, %60 : vector<8x32xf32>
    %63 = arith.addf %61, %62 : vector<8x32xf32>
    %64 = math.tanh %63 : vector<8x32xf32>
    %65 = arith.mulf %58, %64 : vector<8x32xf32>
    %c24 = arith.constant 24 : index
    %c0_19 = arith.constant 0 : index
    %66 = vector.load %arg6[%c24, %c0_19] : memref<64x128xf32, #tpu.memory_space<vmem>>, vector<8x128xf32>
    %cst_20 = arith.constant dense<0.000000e+00> : vector<8x128xf32>
    %67 = tpu.matmul %65, %9, %cst_20 {dimension_numbers = #tpu.dot_dimension_numbers<[1], [0], [0], [1], [0, 0, 1, 1], [], []>} : vector<8x32xf32>, vector<32x128xf32>, vector<8x128xf32> -> vector<8x128xf32>
    %68 = arith.addf %66, %67 : vector<8x128xf32>
    %69 = arith.negf %68 : vector<8x128xf32>
    %70 = math.exp %69 : vector<8x128xf32>
    %cst_21 = arith.constant 1.000000e+00 : f32
    %71 = vector.broadcast %cst_21 : f32 to vector<8x128xf32>
    %72 = arith.addf %71, %70 : vector<8x128xf32>
    %73 = arith.divf %71, %72 : vector<8x128xf32>
    %74 = vector.extract_strided_slice %73 {offsets = [0, 0], sizes = [8, 32], strides = [1, 1]} : vector<8x128xf32> to vector<8x32xf32>
    %75 = vector.extract_strided_slice %73 {offsets = [0, 32], sizes = [8, 32], strides = [1, 1]} : vector<8x128xf32> to vector<8x32xf32>
    %76 = vector.extract_strided_slice %73 {offsets = [0, 96], sizes = [8, 32], strides = [1, 1]} : vector<8x128xf32> to vector<8x32xf32>
    %77 = vector.extract_strided_slice %68 {offsets = [0, 64], sizes = [8, 32], strides = [1, 1]} : vector<8x128xf32> to vector<8x32xf32>
    %78 = math.tanh %77 : vector<8x32xf32>
    %79 = arith.mulf %75, %63 : vector<8x32xf32>
    %80 = arith.mulf %74, %78 : vector<8x32xf32>
    %81 = arith.addf %79, %80 : vector<8x32xf32>
    %82 = math.tanh %81 : vector<8x32xf32>
    %83 = arith.mulf %76, %82 : vector<8x32xf32>
    %c32 = arith.constant 32 : index
    %c0_22 = arith.constant 0 : index
    %84 = vector.load %arg6[%c32, %c0_22] : memref<64x128xf32, #tpu.memory_space<vmem>>, vector<8x128xf32>
    %cst_23 = arith.constant dense<0.000000e+00> : vector<8x128xf32>
    %85 = tpu.matmul %83, %9, %cst_23 {dimension_numbers = #tpu.dot_dimension_numbers<[1], [0], [0], [1], [0, 0, 1, 1], [], []>} : vector<8x32xf32>, vector<32x128xf32>, vector<8x128xf32> -> vector<8x128xf32>
    %86 = arith.addf %84, %85 : vector<8x128xf32>
    %87 = arith.negf %86 : vector<8x128xf32>
    %88 = math.exp %87 : vector<8x128xf32>
    %cst_24 = arith.constant 1.000000e+00 : f32
    %89 = vector.broadcast %cst_24 : f32 to vector<8x128xf32>
    %90 = arith.addf %89, %88 : vector<8x128xf32>
    %91 = arith.divf %89, %90 : vector<8x128xf32>
    %92 = vector.extract_strided_slice %91 {offsets = [0, 0], sizes = [8, 32], strides = [1, 1]} : vector<8x128xf32> to vector<8x32xf32>
    %93 = vector.extract_strided_slice %91 {offsets = [0, 32], sizes = [8, 32], strides = [1, 1]} : vector<8x128xf32> to vector<8x32xf32>
    %94 = vector.extract_strided_slice %91 {offsets = [0, 96], sizes = [8, 32], strides = [1, 1]} : vector<8x128xf32> to vector<8x32xf32>
    %95 = vector.extract_strided_slice %86 {offsets = [0, 64], sizes = [8, 32], strides = [1, 1]} : vector<8x128xf32> to vector<8x32xf32>
    %96 = math.tanh %95 : vector<8x32xf32>
    %97 = arith.mulf %93, %81 : vector<8x32xf32>
    %98 = arith.mulf %92, %96 : vector<8x32xf32>
    %99 = arith.addf %97, %98 : vector<8x32xf32>
    %100 = math.tanh %99 : vector<8x32xf32>
    %101 = arith.mulf %94, %100 : vector<8x32xf32>
    %c40 = arith.constant 40 : index
    %c0_25 = arith.constant 0 : index
    %102 = vector.load %arg6[%c40, %c0_25] : memref<64x128xf32, #tpu.memory_space<vmem>>, vector<8x128xf32>
    %cst_26 = arith.constant dense<0.000000e+00> : vector<8x128xf32>
    %103 = tpu.matmul %101, %9, %cst_26 {dimension_numbers = #tpu.dot_dimension_numbers<[1], [0], [0], [1], [0, 0, 1, 1], [], []>} : vector<8x32xf32>, vector<32x128xf32>, vector<8x128xf32> -> vector<8x128xf32>
    %104 = arith.addf %102, %103 : vector<8x128xf32>
    %105 = arith.negf %104 : vector<8x128xf32>
    %106 = math.exp %105 : vector<8x128xf32>
    %cst_27 = arith.constant 1.000000e+00 : f32
    %107 = vector.broadcast %cst_27 : f32 to vector<8x128xf32>
    %108 = arith.addf %107, %106 : vector<8x128xf32>
    %109 = arith.divf %107, %108 : vector<8x128xf32>
    %110 = vector.extract_strided_slice %109 {offsets = [0, 0], sizes = [8, 32], strides = [1, 1]} : vector<8x128xf32> to vector<8x32xf32>
    %111 = vector.extract_strided_slice %109 {offsets = [0, 32], sizes = [8, 32], strides = [1, 1]} : vector<8x128xf32> to vector<8x32xf32>
    %112 = vector.extract_strided_slice %109 {offsets = [0, 96], sizes = [8, 32], strides = [1, 1]} : vector<8x128xf32> to vector<8x32xf32>
    %113 = vector.extract_strided_slice %104 {offsets = [0, 64], sizes = [8, 32], strides = [1, 1]} : vector<8x128xf32> to vector<8x32xf32>
    %114 = math.tanh %113 : vector<8x32xf32>
    %115 = arith.mulf %111, %99 : vector<8x32xf32>
    %116 = arith.mulf %110, %114 : vector<8x32xf32>
    %117 = arith.addf %115, %116 : vector<8x32xf32>
    %118 = math.tanh %117 : vector<8x32xf32>
    %119 = arith.mulf %112, %118 : vector<8x32xf32>
    %c48 = arith.constant 48 : index
    %c0_28 = arith.constant 0 : index
    %120 = vector.load %arg6[%c48, %c0_28] : memref<64x128xf32, #tpu.memory_space<vmem>>, vector<8x128xf32>
    %cst_29 = arith.constant dense<0.000000e+00> : vector<8x128xf32>
    %121 = tpu.matmul %119, %9, %cst_29 {dimension_numbers = #tpu.dot_dimension_numbers<[1], [0], [0], [1], [0, 0, 1, 1], [], []>} : vector<8x32xf32>, vector<32x128xf32>, vector<8x128xf32> -> vector<8x128xf32>
    %122 = arith.addf %120, %121 : vector<8x128xf32>
    %123 = arith.negf %122 : vector<8x128xf32>
    %124 = math.exp %123 : vector<8x128xf32>
    %cst_30 = arith.constant 1.000000e+00 : f32
    %125 = vector.broadcast %cst_30 : f32 to vector<8x128xf32>
    %126 = arith.addf %125, %124 : vector<8x128xf32>
    %127 = arith.divf %125, %126 : vector<8x128xf32>
    %128 = vector.extract_strided_slice %127 {offsets = [0, 0], sizes = [8, 32], strides = [1, 1]} : vector<8x128xf32> to vector<8x32xf32>
    %129 = vector.extract_strided_slice %127 {offsets = [0, 32], sizes = [8, 32], strides = [1, 1]} : vector<8x128xf32> to vector<8x32xf32>
    %130 = vector.extract_strided_slice %127 {offsets = [0, 96], sizes = [8, 32], strides = [1, 1]} : vector<8x128xf32> to vector<8x32xf32>
    %131 = vector.extract_strided_slice %122 {offsets = [0, 64], sizes = [8, 32], strides = [1, 1]} : vector<8x128xf32> to vector<8x32xf32>
    %132 = math.tanh %131 : vector<8x32xf32>
    %133 = arith.mulf %129, %117 : vector<8x32xf32>
    %134 = arith.mulf %128, %132 : vector<8x32xf32>
    %135 = arith.addf %133, %134 : vector<8x32xf32>
    %136 = math.tanh %135 : vector<8x32xf32>
    %137 = arith.mulf %130, %136 : vector<8x32xf32>
    %c56 = arith.constant 56 : index
    %c0_31 = arith.constant 0 : index
    %138 = vector.load %arg6[%c56, %c0_31] : memref<64x128xf32, #tpu.memory_space<vmem>>, vector<8x128xf32>
    %cst_32 = arith.constant dense<0.000000e+00> : vector<8x128xf32>
    %139 = tpu.matmul %137, %9, %cst_32 {dimension_numbers = #tpu.dot_dimension_numbers<[1], [0], [0], [1], [0, 0, 1, 1], [], []>} : vector<8x32xf32>, vector<32x128xf32>, vector<8x128xf32> -> vector<8x128xf32>
    %140 = arith.addf %138, %139 : vector<8x128xf32>
    %141 = arith.negf %140 : vector<8x128xf32>
    %142 = math.exp %141 : vector<8x128xf32>
    %cst_33 = arith.constant 1.000000e+00 : f32
    %143 = vector.broadcast %cst_33 : f32 to vector<8x128xf32>
    %144 = arith.addf %143, %142 : vector<8x128xf32>
    %145 = arith.divf %143, %144 : vector<8x128xf32>
    %146 = vector.extract_strided_slice %145 {offsets = [0, 0], sizes = [8, 32], strides = [1, 1]} : vector<8x128xf32> to vector<8x32xf32>
    %147 = vector.extract_strided_slice %145 {offsets = [0, 32], sizes = [8, 32], strides = [1, 1]} : vector<8x128xf32> to vector<8x32xf32>
    %148 = vector.extract_strided_slice %145 {offsets = [0, 96], sizes = [8, 32], strides = [1, 1]} : vector<8x128xf32> to vector<8x32xf32>
    %149 = vector.extract_strided_slice %140 {offsets = [0, 64], sizes = [8, 32], strides = [1, 1]} : vector<8x128xf32> to vector<8x32xf32>
    %150 = math.tanh %149 : vector<8x32xf32>
    %151 = arith.mulf %147, %135 : vector<8x32xf32>
    %152 = arith.mulf %146, %150 : vector<8x32xf32>
    %153 = arith.addf %151, %152 : vector<8x32xf32>
    %154 = math.tanh %153 : vector<8x32xf32>
    %155 = arith.mulf %148, %154 : vector<8x32xf32>
    %c0_34 = arith.constant 0 : index
    %c0_35 = arith.constant 0 : index
    %156 = vector.load %arg3[%c0_34, %c0_35] : memref<32x128xf32, #tpu.memory_space<vmem>>, vector<32x128xf32>
    %cst_36 = arith.constant dense<0.000000e+00> : vector<8x128xf32>
    %157 = tpu.matmul %155, %156, %cst_36 {dimension_numbers = #tpu.dot_dimension_numbers<[1], [0], [0], [1], [0, 0, 1, 1], [], []>} : vector<8x32xf32>, vector<32x128xf32>, vector<8x128xf32> -> vector<8x128xf32>
    %c0_37 = arith.constant 0 : index
    %c0_38 = arith.constant 0 : index
    %158 = vector.load %arg4[%c0_37, %c0_38] : memref<1x128xf32, #tpu.memory_space<vmem>>, vector<1x128xf32>
    %159 = vector.broadcast %158 : vector<1x128xf32> to vector<8x128xf32>
    %160 = arith.addf %157, %159 : vector<8x128xf32>
    %c0_39 = arith.constant 0 : index
    %c0_40 = arith.constant 0 : index
    %161 = vector.load %arg5[%c0_39, %c0_40] : memref<8x128xf32, #tpu.memory_space<vmem>>, vector<8x128xf32>
    tpu.vector_store %arg5[%c0_39, %c0_40], %160 {strides = array<i32>} : memref<8x128xf32, #tpu.memory_space<vmem>>, vector<8x128xf32>,
    return
  }
}

</mosaic_0001>

<bundles_post_ra>
// kernel: tpu_custom_call.1
= control target key start
LH: loop header
LB: loop body
LE: loop exit
PB: predicated region body
PF: predicated region fallthrough
CT: control target
= control target key end

     0   :  { %10 = vsyncpa [#allocation4], 0  ;;  %s1741_s0 = inlined_call_operand.vmem [shape: s32[64,1], index: 0, kind: input, shape index: {}]   ;;  %s1742_s1 = inlined_call_operand.hbm [shape: f32[16,128], index: 1, kind: input, shape index: {}]   ;;  %s1743_s2 = inlined_call_operand.vmem [shape: f32[32,128], index: 2, kind: input, shape index: {}]   ;;  %s1744_s3 = inlined_call_operand.vmem [shape: f32[32,128], index: 3, kind: input, shape index: {}]   ;;  %s1745_s4 = inlined_call_operand.vmem [shape: f32[1,128], index: 4, kind: input, shape index: {}]   ;;  %s1746_s5 = inlined_call_operand.hbm [shape: f32[8,128], index: 5, kind: output, shape index: {}]  }
   0x1   :  { %11 = vsyncpa [#allocation5], 0  ;;  %s1468_s18 = smov [#allocation3]  }
   0x2   :  { %s19_s19 = sshll.u32 %s1468_s18, 4  ;;  %s20_s19 = int_to_ptr.vmem [resolvable:$true] %s19_s19 }
   0x3   :  { %s1432_s20 = scalar_lea.vmem %s20_s19, 256  ;;  %p1437_p1 = scmp.lt.s32.totalorder %s20_s19, %s20_s19 }
   0x4   :  { %p1433_p0 = scmp.ne.s32.totalorder %s20_s19, %s1432_s20  ;;  %p1438_p2 = scmp.lt.s32.totalorder %s1432_s20, %s1432_s20 }
   0x6   :  { %p1439_p3 = por %p1438_p2, %p1437_p1 }
   0x8   :  { %p1440_p4 = pnand %p1439_p3, %p1433_p0 }
   0xa   :  { %1443 = shalt.err (!%p1440_p4)
}
   0xb   :  { %s1469_s21 = smov 128   ;;  %s1470_s22 = smov 8  }
   0xc   :  { %25 = dma.hbm_to_vmem [thread:$0]  %s1742_s1, 256, %s20_s19, [#allocation4], %s1469_s21, %s1469_s21, %s1470_s22  }
   0xd   :  { %1464 = dma.done.wait [#allocation4], 256  }
   0xe   :  { %1465 = vsyncadd [#allocation4], 4294967040  ;;  %v1471_v0 = vmov 0   ;;  %v1472_v1 = vmov 0.0   ;;  %v35_v2 = vld [vmem:[%s1741_s0] sm:$0xff]  ;;  %v1517_v3 = vld [vmem:[%s1743_s2 + $0x18] sm:$0xff]  ;;  %v43_v10 = vlaneseq }
   0xf   :  { %1358 = vset.pattern.permute.xlu0 %v1471_v0  ;;  %1250 = vmatprep.subr.mxu1 %v1472_v1  ;;  %v1523_v4 = vld [vmem:[%s1743_s2 + $0x10] sm:$0xff]  ;;  %v94_v5 = vld [vmem:[#allocation3 + $0x8] sm:$0xff]  ;;  %v93_v8 = vld [vmem:[#allocation3] sm:$0xff]  ;;  %vm1473_vm0 = vmmov 0   ;;  %vm95_vm1 = vcmask 130048   ;;  %s1475_s11 = smov 32  }
  0x10   :  { %1359 = vset.pattern.permute.xlu1 %v1471_v0  ;;  %46 = vperm.xlu0 %1358, %v35_v2   ;;  %v36_v6 = vld [vmem:[%s1741_s0 + $0x8] sm:$0xff]  ;;  %v1539_v9 = vld [vmem:[%s1743_s2] sm:$0xff]  ;;  %v1559_v11 = vand.u32 127, %v43_v10  ;;  %vm238_vm4 = vcmask 261120   ;;  %v37_v45 = vld [vmem:[%s1741_s0 + $0x10] sm:$0xff]  ;;  %s1476_s7 = smov [#allocation6]  }
  0x11   :  { %1251 = vmatpush3.msra.mxu1 %v1517_v3  ;;  %1234 = vmatprep.subr.mxu0 %v94_v5  ;;  %v1532_v7 = vld [vmem:[%s1743_s2 + $0x8] sm:$0xff]  ;;  %s1474_s2 = smov 64   ;;  %v39_v46 = vld [vmem:[%s1741_s0 + $0x20] sm:$0xff]  ;;  %v41_v47 = vld [vmem:[%s1741_s0 + $0x30] sm:$0xff] }
  0x12   :  { %1252 = vmatprep.subr.mxu1 %v1472_v1  ;;  %1235 = vmatpush3.msra.mxu0 %v94_v5  ;;  %v38_v54 = vld [vmem:[%s1741_s0 + $0x18] sm:$0xff]  ;;  %v40_v55 = vld [vmem:[%s1741_s0 + $0x28] sm:$0xff] }
  0x13   :  { %1253 = vmatpush3.msra.mxu1 %v1523_v4  ;;  %1236 = vmatprep.subr.mxu0 %v93_v8  ;;  %v42_v56 = vld [vmem:[%s1741_s0 + $0x38] sm:$0xff] }
  0x14   :  { %1254 = vmatprep.subr.mxu1 %v1472_v1  ;;  %49 = vperm.xlu0 %1358, %v36_v6  }
  0x15   :  { %1255 = vmatpush3.msra.mxu1 %v1532_v7  ;;  %1237 = vmatpush3.msra.mxu0 %v93_v8 }
  0x16   :  { %1256 = vmatprep.subr.mxu1 %v1472_v1  ;;  %1258 = vmatprep.mubr.msk.f32.mxu1 %vm1473_vm0, %v1472_v1 }
  0x17   :  { %1257 = vmatpush3.msra.mxu1 %v1539_v9  ;;  %1272 = vmatprep.subr.mxu0 %v1472_v1 }
  0x18   :  { %1259 = vmatmul.mubr.f32.vlgmr.msra.gmra.mxu1 %v1472_v1  ;;  %1261 = vmatprep.subr.mxu1 %v1472_v1 }
  0x19   :  { %1262 = vmatpush3.msra.mxu1 %v1517_v3  ;;  %1269 = vmatprep.mubr.msk.f32.mxu1 %vm1473_vm0, %v1472_v1 }
  0x1a   :  { %1263 = vmatprep.subr.mxu1 %v1472_v1 }
  0x1b   :  { %1264 = vmatpush3.msra.mxu1 %v1523_v4 }
  0x1c   :  { %1265 = vmatprep.subr.mxu1 %v1472_v1 }
  0x1d   :  { %1266 = vmatpush3.msra.mxu1 %v1532_v7 }
  0x1e   :  { %1267 = vmatprep.subr.mxu1 %v1472_v1 }
  0x1f   :  { %1268 = vmatpush3.msra.mxu1 %v1539_v9 }
  0x20   :  { %1283 = vmatprep.subr.mxu1 %v1472_v1 }
  0x8b   :  { %v47_v12 = vpop.permute.xlu0 %46 }
  0x8c   :  { %vm69_vm2 = vcmp.eq.s32.totalorder %v47_v12, %v1559_v11 }
  0x8d   :  { %v1146_v13 = vsel %vm69_vm2, 1.0, %v1472_v1 }
  0x8e   :  { %1238 = vmatprep.mubr.msk.f32.mxu0 %vm95_vm1, %v1146_v13 }
  0x8f   :  { %v50_v14 = vpop.permute.xlu0 %49 }
  0x90   :  { %vm70_vm3 = vcmp.eq.s32.totalorder %v50_v14, %v1559_v11 }
  0x91   :  { %v1147_v15 = vsel %vm70_vm3, 1.0, %v1472_v1 }
  0x92   :  { %1239 = vmatmul.mubr.msk.f32.vlgmr.msra.gmra.mxu0 %vm95_vm1, %v1147_v15 }
  0x93   :  { %1273 = vmatpush3.msra.mxu0 %v1517_v3 }
  0x94   :  { %1274 = vmatprep.subr.mxu0 %v1472_v1 }
  0x95   :  { %1275 = vmatpush3.msra.mxu0 %v1523_v4 }
  0x96   :  { %1276 = vmatprep.subr.mxu0 %v1472_v1 }
  0x97   :  { %1277 = vmatpush3.msra.mxu0 %v1532_v7 }
  0x98   :  { %1278 = vmatprep.subr.mxu0 %v1472_v1 }
  0x99   :  { %1279 = vmatpush3.msra.mxu0 %v1539_v9 }
  0x9a   :  { %1294 = vmatprep.subr.mxu0 %v1472_v1 }
  0xd8   :  { %v308_v16 = vpop.f32.mrf.mxu1 }
  0xda   :  { %v1260_v17 = vpop.f32.mrf.mxu1 }
 0x152   :  { %v1240_v18 = vpop.f32.mrf.mxu0 }
 0x154   :  { %v186_v19 = vpop.f32.mrf.mxu0 }
 0x155   :  { %v312_v20 = vadd.f32 %v308_v16, %v186_v19 }
 0x157   :  { %1360 = vtanh.f32 %v312_v20  ;;  %v1162_v22 = vmul.f32 -1.442695, %v312_v20 }
 0x159   :  { %1362 = vpow2.f32 %v1162_v22 }
 0x164   :  { %v1361_v21 = vpop.eup %1360 }
 0x165   :  { %322 = vrot.lane.b32.xlu1 %v1361_v21, %s1474_s2 }
 0x166   :  { %v1363_v23 = vpop.eup %1362 }
 0x167   :  { %v316_v24 = vadd.f32 1.0, %v1363_v23 }
 0x169   :  { %1364 = vrcp.f32 %v316_v24 }
 0x176   :  { %v1365_v25 = vpop.eup %1364 }
 0x177   :  { %v320_v28 = vmul.f32 0.0, %v1365_v25 }
 0x1d7   :  { %v323_v26 = vpop.permute.xlu1 %322 }
 0x1d8   :  { %v325_v27 = vmul.f32 %v1365_v25, %v323_v26 }
 0x1da   :  { %327 = vrot.lane.b32.xlu1 %v325_v27, %s1475_s11 }
 0x24c   :  { %v328_v29 = vpop.permute.xlu1 %327 }
 0x24d   :  { %v330_v30 = vadd.f32 %v328_v29, %v320_v28 }
 0x24f   :  { %1366 = vtanh.f32 %v330_v30 }
 0x25c   :  { %v1367_v31 = vpop.eup %1366 }
 0x25d   :  { %333 = vrot.lane.b32.xlu0 %v1367_v31, %s1474_s2 }
 0x2cf   :  { %v334_v32 = vpop.permute.xlu0 %333 }
 0x2d0   :  { %v336_v33 = vmul.f32 %v1365_v25, %v334_v32 }
 0x2d2   :  { %339 = vrot.lane.b32.xlu1 %v336_v33, %s1475_s11 }
 0x344   :  { %v340_v34 = vpop.permute.xlu1 %339 }
 0x345   :  { %1270 = vmatmul.mubr.msk.f32.vlgmr.msra.gmra.mxu1 %vm238_vm4, %v340_v34 }
 0x346   :  { %1284 = vmatpush3.msra.mxu1 %v1517_v3  ;;  %1291 = vmatprep.mubr.msk.f32.mxu1 %vm1473_vm0, %v1472_v1 }
 0x347   :  { %1285 = vmatprep.subr.mxu1 %v1472_v1 }
 0x348   :  { %1286 = vmatpush3.msra.mxu1 %v1523_v4 }
 0x349   :  { %1287 = vmatprep.subr.mxu1 %v1472_v1 }
 0x34a   :  { %1288 = vmatpush3.msra.mxu1 %v1532_v7 }
 0x34b   :  { %1289 = vmatprep.subr.mxu1 %v1472_v1 }
 0x34c   :  { %1290 = vmatpush3.msra.mxu1 %v1539_v9 }
 0x34d   :  { %1305 = vmatprep.subr.mxu1 %v1472_v1 }
 0x405   :  { %v409_v35 = vpop.f32.mrf.mxu1 }
 0x406   :  { %v413_v36 = vadd.f32 %v1240_v18, %v409_v35 }
 0x407   :  { %v1271_v37 = vpop.f32.mrf.mxu1 }
 0x408   :  { %1368 = vtanh.f32 %v413_v36  ;;  %v1164_v39 = vmul.f32 -1.442695, %v413_v36 }
 0x40a   :  { %1370 = vpow2.f32 %v1164_v39 }
 0x415   :  { %v1369_v38 = vpop.eup %1368 }
 0x416   :  { %423 = vrot.lane.b32.xlu0 %v1369_v38, %s1474_s2 }
 0x417   :  { %v1371_v40 = vpop.eup %1370 }
 0x418   :  { %v417_v41 = vadd.f32 1.0, %v1371_v40 }
 0x41a   :  { %1372 = vrcp.f32 %v417_v41 }
 0x427   :  { %v1373_v42 = vpop.eup %1372 }
 0x428   :  { %v421_v48 = vmul.f32 %v1373_v42, %v330_v30 }
 0x488   :  { %v424_v43 = vpop.permute.xlu0 %423 }
 0x489   :  { %v426_v44 = vmul.f32 %v1373_v42, %v424_v43 }
 0x48b   :  { %428 = vrot.lane.b32.xlu1 %v426_v44, %s1475_s11 }
 0x48f   :  { %52 = vperm.xlu1 %1359, %v37_v45  }
 0x493   :  { %58 = vperm.xlu1 %1359, %v39_v46  }
 0x497   :  { %64 = vperm.xlu1 %1359, %v41_v47  }
 0x4fd   :  { %v429_v49 = vpop.permute.xlu1 %428 }
 0x4fe   :  { %v1601_v50 = vadd.f32 %v429_v49, %v421_v48 }
 0x500   :  { %1374 = vtanh.f32 %v1601_v50 }
 0x50a   :  { %v53_v51 = vpop.permute.xlu1 %52 }
 0x50b   :  { %vm71_vm5 = vcmp.eq.s32.totalorder %v53_v51, %v1559_v11 }
 0x50c   :  { %v1148_v52 = vsel %vm71_vm5, 1.0, %v1472_v1 }
 0x50d   :  { %v1375_v53 = vpop.eup %1374  ;;  %1241 = vmatprep.mubr.msk.f32.mxu0 %vm95_vm1, %v1148_v52 }
 0x50e   :  { %434 = vrot.lane.b32.xlu0 %v1375_v53, %s1474_s2  ;;  %v59_v59 = vpop.permute.xlu1 %58 }
 0x50f   :  { %vm73_vm6 = vcmp.eq.s32.totalorder %v59_v59, %v1559_v11 }
 0x510   :  { %v1150_v62 = vsel %vm73_vm6, 1.0, %v1472_v1 }
 0x512   :  { %55 = vperm.xlu0 %1358, %v38_v54   ;;  %v65_v60 = vpop.permute.xlu1 %64 }
 0x513   :  { %vm75_vm8 = vcmp.eq.s32.totalorder %v65_v60, %v1559_v11 }
 0x514   :  { %v1152_v2 = vsel %vm75_vm8, 1.0, %v1472_v1 }
 0x516   :  { %61 = vperm.xlu0 %1358, %v40_v55  }
 0x51a   :  { %67 = vperm.xlu0 %1358, %v42_v56  }
 0x580   :  { %v435_v57 = vpop.permute.xlu0 %434 }
 0x581   :  { %v437_v58 = vmul.f32 %v1373_v42, %v435_v57 }
 0x583   :  { %440 = vrot.lane.b32.xlu1 %v437_v58, %s1475_s11 }
 0x58d   :  { %v56_v61 = vpop.permute.xlu0 %55 }
 0x58e   :  { %vm72_vm7 = vcmp.eq.s32.totalorder %v56_v61, %v1559_v11 }
 0x58f   :  { %v1149_v63 = vsel %vm72_vm7, 1.0, %v1472_v1 }
 0x590   :  { %1242 = vmatmul.mubr.msk.f32.gmra.mxu0 %vm95_vm1, %v1149_v63 }
 0x591   :  { %v62_v0 = vpop.permute.xlu0 %61  ;;  %1244 = vmatprep.mubr.msk.f32.mxu0 %vm95_vm1, %v1150_v62 }
 0x592   :  { %vm74_vm9 = vcmp.eq.s32.totalorder %v62_v0, %v1559_v11 }
 0x593   :  { %v1151_v5 = vsel %vm74_vm9, 1.0, %v1472_v1 }
 0x594   :  { %1245 = vmatmul.mubr.msk.f32.gmra.mxu0 %vm95_vm1, %v1151_v5 }
 0x595   :  { %v68_v6 = vpop.permute.xlu0 %67  ;;  %1247 = vmatprep.mubr.msk.f32.mxu0 %vm95_vm1, %v1152_v2 }
 0x596   :  { %vm76_vm10 = vcmp.eq.s32.totalorder %v68_v6, %v1559_v11 }
 0x597   :  { %v1153_v8 = vsel %vm76_vm10, 1.0, %v1472_v1 }
 0x598   :  { %1248 = vmatmul.mubr.msk.f32.gmra.mxu0 %vm95_vm1, %v1153_v8 }
 0x599   :  { %1280 = vmatprep.mubr.msk.f32.mxu0 %vm1473_vm0, %v1472_v1 }
 0x5f5   :  { %v441_v10 = vpop.permute.xlu1 %440 }
 0x5f6   :  { %1281 = vmatmul.mubr.msk.f32.vlgmr.msra.gmra.mxu0 %vm238_vm4, %v441_v10 }
 0x5f7   :  { %1295 = vmatpush3.msra.mxu0 %v1517_v3  ;;  %1302 = vmatprep.mubr.msk.f32.mxu0 %vm1473_vm0, %v1472_v1 }
 0x5f8   :  { %1296 = vmatprep.subr.mxu0 %v1472_v1 }
 0x5f9   :  { %1297 = vmatpush3.msra.mxu0 %v1523_v4 }
 0x5fa   :  { %1298 = vmatprep.subr.mxu0 %v1472_v1 }
 0x5fb   :  { %1299 = vmatpush3.msra.mxu0 %v1532_v7 }
 0x5fc   :  { %1300 = vmatprep.subr.mxu0 %v1472_v1 }
 0x5fd   :  { %1301 = vmatpush3.msra.mxu0 %v1539_v9 }
 0x5fe   :  { %1316 = vmatprep.subr.mxu0 %v1472_v1 }
 0x650   :  { %v1243_v11 = vpop.f32.mrf.mxu0 }
 0x652   :  { %v196_v12 = vpop.f32.mrf.mxu0 }
 0x654   :  { %v1646_v13 = vpop.f32.mrf.mxu0 }
 0x656   :  { %v1648_v14 = vpop.f32.mrf.mxu0 }
 0x658   :  { %v1650_v15 = vpop.f32.mrf.mxu0 }
 0x65a   :  { %v1652_v16 = vpop.f32.mrf.mxu0 }
 0x6b6   :  { %v510_v17 = vpop.f32.mrf.mxu0 }
 0x6b7   :  { %v514_v18 = vadd.f32 %v510_v17, %v196_v12 }
 0x6b8   :  { %v1282_v19 = vpop.f32.mrf.mxu0 }
 0x6b9   :  { %1376 = vtanh.f32 %v514_v18  ;;  %v1166_v21 = vmul.f32 -1.442695, %v514_v18 }
 0x6bb   :  { %1378 = vpow2.f32 %v1166_v21 }
 0x6c6   :  { %v1377_v20 = vpop.eup %1376 }
 0x6c7   :  { %524 = vrot.lane.b32.xlu0 %v1377_v20, %s1474_s2 }
 0x6c8   :  { %v1379_v22 = vpop.eup %1378 }
 0x6c9   :  { %v518_v23 = vadd.f32 1.0, %v1379_v22 }
 0x6cb   :  { %1380 = vrcp.f32 %v518_v23 }
 0x6d8   :  { %v1381_v24 = vpop.eup %1380 }
 0x6d9   :  { %v522_v27 = vmul.f32 %v1381_v24, %v1601_v50 }
 0x739   :  { %v525_v25 = vpop.permute.xlu0 %524 }
 0x73a   :  { %v527_v26 = vmul.f32 %v1381_v24, %v525_v25 }
 0x73c   :  { %529 = vrot.lane.b32.xlu1 %v527_v26, %s1475_s11 }
 0x7ae   :  { %v530_v28 = vpop.permute.xlu1 %529 }
 0x7af   :  { %v532_v29 = vadd.f32 %v530_v28, %v522_v27 }
 0x7b1   :  { %1382 = vtanh.f32 %v532_v29 }
 0x7be   :  { %v1383_v30 = vpop.eup %1382 }
 0x7bf   :  { %535 = vrot.lane.b32.xlu0 %v1383_v30, %s1474_s2 }
 0x831   :  { %v536_v31 = vpop.permute.xlu0 %535 }
 0x832   :  { %v538_v32 = vmul.f32 %v1381_v24, %v536_v31 }
 0x834   :  { %541 = vrot.lane.b32.xlu1 %v538_v32, %s1475_s11 }
 0x8a6   :  { %v542_v33 = vpop.permute.xlu1 %541 }
 0x8a7   :  { %1292 = vmatmul.mubr.msk.f32.vlgmr.msra.gmra.mxu1 %vm238_vm4, %v542_v33 }
 0x8a8   :  { %1306 = vmatpush3.msra.mxu1 %v1517_v3  ;;  %1313 = vmatprep.mubr.msk.f32.mxu1 %vm1473_vm0, %v1472_v1 }
 0x8a9   :  { %1307 = vmatprep.subr.mxu1 %v1472_v1 }
 0x8aa   :  { %1308 = vmatpush3.msra.mxu1 %v1523_v4 }
 0x8ab   :  { %1309 = vmatprep.subr.mxu1 %v1472_v1 }
 0x8ac   :  { %1310 = vmatpush3.msra.mxu1 %v1532_v7 }
 0x8ad   :  { %1311 = vmatprep.subr.mxu1 %v1472_v1 }
 0x8ae   :  { %1312 = vmatpush3.msra.mxu1 %v1539_v9 }
 0x8af   :  { %1327 = vmatprep.subr.mxu1 %v1472_v1 }
 0x967   :  { %v611_v34 = vpop.f32.mrf.mxu1 }
 0x968   :  { %v615_v35 = vadd.f32 %v1243_v11, %v611_v34 }
 0x969   :  { %v1293_v36 = vpop.f32.mrf.mxu1 }
 0x96a   :  { %1384 = vtanh.f32 %v615_v35  ;;  %v1168_v38 = vmul.f32 -1.442695, %v615_v35 }
 0x96c   :  { %1386 = vpow2.f32 %v1168_v38 }
 0x977   :  { %v1385_v37 = vpop.eup %1384 }
 0x978   :  { %625 = vrot.lane.b32.xlu0 %v1385_v37, %s1474_s2 }
 0x979   :  { %v1387_v39 = vpop.eup %1386 }
 0x97a   :  { %v619_v40 = vadd.f32 1.0, %v1387_v39 }
 0x97c   :  { %1388 = vrcp.f32 %v619_v40 }
 0x989   :  { %v1389_v41 = vpop.eup %1388 }
 0x98a   :  { %v623_v44 = vmul.f32 %v1389_v41, %v532_v29 }
 0x9ea   :  { %v626_v42 = vpop.permute.xlu0 %625 }
 0x9eb   :  { %v628_v43 = vmul.f32 %v1389_v41, %v626_v42 }
 0x9ed   :  { %630 = vrot.lane.b32.xlu1 %v628_v43, %s1475_s11 }
 0xa5f   :  { %v631_v45 = vpop.permute.xlu1 %630 }
 0xa60   :  { %v633_v46 = vadd.f32 %v631_v45, %v623_v44 }
 0xa62   :  { %1390 = vtanh.f32 %v633_v46 }
 0xa6f   :  { %v1391_v47 = vpop.eup %1390 }
 0xa70   :  { %636 = vrot.lane.b32.xlu0 %v1391_v47, %s1474_s2 }
 0xae2   :  { %v637_v48 = vpop.permute.xlu0 %636 }
 0xae3   :  { %v639_v49 = vmul.f32 %v1389_v41, %v637_v48 }
 0xae5   :  { %642 = vrot.lane.b32.xlu1 %v639_v49, %s1475_s11 }
 0xb57   :  { %v643_v50 = vpop.permute.xlu1 %642 }
 0xb58   :  { %1303 = vmatmul.mubr.msk.f32.vlgmr.msra.gmra.mxu0 %vm238_vm4, %v643_v50 }
 0xb59   :  { %1317 = vmatpush3.msra.mxu0 %v1517_v3  ;;  %1324 = vmatprep.mubr.msk.f32.mxu0 %vm1473_vm0, %v1472_v1 }
 0xb5a   :  { %1318 = vmatprep.subr.mxu0 %v1472_v1 }
 0xb5b   :  { %1319 = vmatpush3.msra.mxu0 %v1523_v4 }
 0xb5c   :  { %1320 = vmatprep.subr.mxu0 %v1472_v1 }
 0xb5d   :  { %1321 = vmatpush3.msra.mxu0 %v1532_v7 }
 0xb5e   :  { %1322 = vmatprep.subr.mxu0 %v1472_v1 }
 0xb5f   :  { %1323 = vmatpush3.msra.mxu0 %v1539_v9 }
 0xb60   :  { %1338 = vmatprep.subr.mxu0 %v1472_v1 }
 0xc18   :  { %v712_v51 = vpop.f32.mrf.mxu0 }
 0xc19   :  { %v716_v52 = vadd.f32 %v712_v51, %v1648_v14 }
 0xc1a   :  { %v1304_v53 = vpop.f32.mrf.mxu0 }
 0xc1b   :  { %1392 = vtanh.f32 %v716_v52  ;;  %v1170_v55 = vmul.f32 -1.442695, %v716_v52  ;;  %v1046_v53 = vld [vmem:[%s1744_s3 + $0x10] sm:$0xff] }
 0xc1d   :  { %1394 = vpow2.f32 %v1170_v55  ;;  %v1044_v55 = vld [vmem:[%s1744_s3] sm:$0xff] }
 0xc28   :  { %v1393_v54 = vpop.eup %1392 }
 0xc29   :  { %726 = vrot.lane.b32.xlu0 %v1393_v54, %s1474_s2  ;;  %v1045_v54 = vld [vmem:[%s1744_s3 + $0x8] sm:$0xff] }
 0xc2a   :  { %v1395_v56 = vpop.eup %1394 }
 0xc2b   :  { %v720_v57 = vadd.f32 1.0, %v1395_v56 }
 0xc2d   :  { %1396 = vrcp.f32 %v720_v57 }
 0xc3a   :  { %v1397_v58 = vpop.eup %1396 }
 0xc3b   :  { %v724_v61 = vmul.f32 %v1397_v58, %v633_v46 }
 0xc9b   :  { %v727_v59 = vpop.permute.xlu0 %726 }
 0xc9c   :  { %v729_v60 = vmul.f32 %v1397_v58, %v727_v59 }
 0xc9e   :  { %731 = vrot.lane.b32.xlu1 %v729_v60, %s1475_s11  ;;  %v1177_v60 = vld [vmem:[%s1745_s4] ss:$0 sm:$0xff] }
 0xd10   :  { %v732_v62 = vpop.permute.xlu1 %731 }
 0xd11   :  { %v734_v63 = vadd.f32 %v732_v62, %v724_v61 }
 0xd13   :  { %1398 = vtanh.f32 %v734_v63 }
 0xd20   :  { %v1399_v0 = vpop.eup %1398 }
 0xd21   :  { %737 = vrot.lane.b32.xlu0 %v1399_v0, %s1474_s2 }
 0xd93   :  { %v738_v2 = vpop.permute.xlu0 %737 }
 0xd94   :  { %v740_v5 = vmul.f32 %v1397_v58, %v738_v2 }
 0xd96   :  { %743 = vrot.lane.b32.xlu1 %v740_v5, %s1475_s11 }
 0xe08   :  { %v744_v6 = vpop.permute.xlu1 %743 }
 0xe09   :  { %1314 = vmatmul.mubr.msk.f32.vlgmr.msra.gmra.mxu1 %vm238_vm4, %v744_v6 }
 0xe0a   :  { %1328 = vmatpush3.msra.mxu1 %v1517_v3  ;;  %1335 = vmatprep.mubr.msk.f32.mxu1 %vm1473_vm0, %v1472_v1 }
 0xe0b   :  { %1329 = vmatprep.subr.mxu1 %v1472_v1 }
 0xe0c   :  { %1330 = vmatpush3.msra.mxu1 %v1523_v4 }
 0xe0d   :  { %1331 = vmatprep.subr.mxu1 %v1472_v1 }
 0xe0e   :  { %1332 = vmatpush3.msra.mxu1 %v1532_v7 }
 0xe0f   :  { %1333 = vmatprep.subr.mxu1 %v1472_v1 }
 0xe10   :  { %1334 = vmatpush3.msra.mxu1 %v1539_v9 }
 0xec9   :  { %v813_v8 = vpop.f32.mrf.mxu1 }
 0xeca   :  { %v817_v10 = vadd.f32 %v1646_v13, %v813_v8 }
 0xecb   :  { %v1315_v11 = vpop.f32.mrf.mxu1 }
 0xecc   :  { %1400 = vtanh.f32 %v817_v10  ;;  %v1172_v12 = vmul.f32 -1.442695, %v817_v10 }
 0xece   :  { %1402 = vpow2.f32 %v1172_v12 }
 0xed9   :  { %v1401_v3 = vpop.eup %1400 }
 0xeda   :  { %827 = vrot.lane.b32.xlu0 %v1401_v3, %s1474_s2 }
 0xedb   :  { %v1403_v14 = vpop.eup %1402 }
 0xedc   :  { %v821_v4 = vadd.f32 1.0, %v1403_v14 }
 0xede   :  { %1404 = vrcp.f32 %v821_v4 }
 0xeeb   :  { %v1405_v17 = vpop.eup %1404 }
 0xeec   :  { %v825_v19 = vmul.f32 %v1405_v17, %v734_v63 }
 0xf4c   :  { %v828_v18 = vpop.permute.xlu0 %827 }
 0xf4d   :  { %v830_v7 = vmul.f32 %v1405_v17, %v828_v18 }
 0xf4f   :  { %832 = vrot.lane.b32.xlu1 %v830_v7, %s1475_s11 }
 0xfc1   :  { %v833_v9 = vpop.permute.xlu1 %832 }
 0xfc2   :  { %v835_v20 = vadd.f32 %v833_v9, %v825_v19 }
 0xfc4   :  { %1406 = vtanh.f32 %v835_v20 }
 0xfd1   :  { %v1407_v13 = vpop.eup %1406 }
 0xfd2   :  { %838 = vrot.lane.b32.xlu0 %v1407_v13, %s1474_s2 }
0x1044   :  { %v839_v21 = vpop.permute.xlu0 %838 }
0x1045   :  { %v841_v22 = vmul.f32 %v1405_v17, %v839_v21 }
0x1047   :  { %844 = vrot.lane.b32.xlu1 %v841_v22, %s1475_s11 }
0x10b9   :  { %v845_v23 = vpop.permute.xlu1 %844 }
0x10ba   :  { %1325 = vmatmul.mubr.msk.f32.vlgmr.msra.gmra.mxu0 %vm238_vm4, %v845_v23 }
0x10bb   :  { %1346 = vmatprep.mubr.msk.f32.mxu0 %vm1473_vm0, %v1472_v1 }
0x117a   :  { %v914_v24 = vpop.f32.mrf.mxu0 }
0x117b   :  { %v918_v25 = vadd.f32 %v914_v24, %v1652_v16 }
0x117c   :  { %v1326_v26 = vpop.f32.mrf.mxu0 }
0x117d   :  { %1408 = vtanh.f32 %v918_v25  ;;  %v1174_v28 = vmul.f32 -1.442695, %v918_v25 }
0x117f   :  { %1410 = vpow2.f32 %v1174_v28 }
0x118a   :  { %v1409_v27 = vpop.eup %1408 }
0x118b   :  { %928 = vrot.lane.b32.xlu0 %v1409_v27, %s1474_s2 }
0x118c   :  { %v1411_v29 = vpop.eup %1410 }
0x118d   :  { %v922_v30 = vadd.f32 1.0, %v1411_v29 }
0x118f   :  { %1412 = vrcp.f32 %v922_v30 }
0x119c   :  { %v1413_v31 = vpop.eup %1412 }
0x119d   :  { %v926_v34 = vmul.f32 %v1413_v31, %v835_v20 }
0x11fd   :  { %v929_v32 = vpop.permute.xlu0 %928 }
0x11fe   :  { %v931_v33 = vmul.f32 %v1413_v31, %v929_v32 }
0x1200   :  { %933 = vrot.lane.b32.xlu1 %v931_v33, %s1475_s11 }
0x1272   :  { %v934_v35 = vpop.permute.xlu1 %933 }
0x1273   :  { %v936_v36 = vadd.f32 %v934_v35, %v926_v34 }
0x1275   :  { %1414 = vtanh.f32 %v936_v36 }
0x1282   :  { %v1415_v16 = vpop.eup %1414 }
0x1283   :  { %939 = vrot.lane.b32.xlu0 %v1415_v16, %s1474_s2 }
0x12f5   :  { %v940_v37 = vpop.permute.xlu0 %939 }
0x12f6   :  { %v942_v38 = vmul.f32 %v1413_v31, %v940_v37 }
0x12f8   :  { %945 = vrot.lane.b32.xlu1 %v942_v38, %s1475_s11 }
0x136a   :  { %v946_v39 = vpop.permute.xlu1 %945 }
0x136b   :  { %1336 = vmatmul.mubr.msk.f32.vlgmr.msra.gmra.mxu1 %vm238_vm4, %v946_v39 }
0x142b   :  { %v1015_v40 = vpop.f32.mrf.mxu1 }
0x142c   :  { %v1019_v41 = vadd.f32 %v1650_v15, %v1015_v40  ;;  %v1047_v15 = vld [vmem:[%s1744_s3 + $0x18] sm:$0xff]  ;;  %s1137_s3 = sshll.u32 %s1476_s7, 4  ;;  %s1138_s3 = int_to_ptr.vmem [resolvable:$true] %s1137_s3 }
0x142d   :  { %v1337_v42 = vpop.f32.mrf.mxu1  ;;  %1339 = vmatpush3.msra.mxu0 %v1047_v15  ;;  %s1444_s8 = scalar_lea.vmem %s1138_s3, 128  ;;  %p1449_p6 = scmp.lt.s32.totalorder %s1138_s3, %s1138_s3 }
0x142e   :  { %1416 = vtanh.f32 %v1019_v41  ;;  %v1176_v44 = vmul.f32 -1.442695, %v1019_v41  ;;  %1340 = vmatprep.subr.mxu0 %v1472_v1  ;;  %p1445_p5 = scmp.ne.s32.totalorder %s1138_s3, %s1444_s8  ;;  %p1450_p7 = scmp.lt.s32.totalorder %s1444_s8, %s1444_s8 }
0x142f   :  { %1341 = vmatpush3.msra.mxu0 %v1046_v53 }
0x1430   :  { %1418 = vpow2.f32 %v1176_v44  ;;  %1342 = vmatprep.subr.mxu0 %v1472_v1  ;;  %p1451_p8 = por %p1450_p7, %p1449_p6 }
0x1431   :  { %1343 = vmatpush3.msra.mxu0 %v1045_v54 }
0x1432   :  { %1344 = vmatprep.subr.mxu0 %v1472_v1  ;;  %p1452_p9 = pnand %p1451_p8, %p1445_p5 }
0x1433   :  { %1345 = vmatpush3.msra.mxu0 %v1044_v55 }
0x143b   :  { %v1417_v43 = vpop.eup %1416 }
0x143c   :  { %1029 = vrot.lane.b32.xlu0 %v1417_v43, %s1474_s2 }
0x143d   :  { %v1419_v45 = vpop.eup %1418 }
0x143e   :  { %v1023_v46 = vadd.f32 1.0, %v1419_v45 }
0x1440   :  { %1420 = vrcp.f32 %v1023_v46 }
0x144d   :  { %v1421_v47 = vpop.eup %1420 }
0x144e   :  { %v1027_v50 = vmul.f32 %v1421_v47, %v936_v36 }
0x14ae   :  { %v1030_v48 = vpop.permute.xlu0 %1029 }
0x14af   :  { %v1032_v49 = vmul.f32 %v1421_v47, %v1030_v48 }
0x14b1   :  { %1034 = vrot.lane.b32.xlu1 %v1032_v49, %s1475_s11 }
0x1523   :  { %v1035_v51 = vpop.permute.xlu1 %1034 }
0x1524   :  { %v1037_v52 = vadd.f32 %v1035_v51, %v1027_v50 }
0x1526   :  { %1422 = vtanh.f32 %v1037_v52 }
0x1533   :  { %v1423_v56 = vpop.eup %1422 }
0x1534   :  { %1040 = vrot.lane.b32.xlu0 %v1423_v56, %s1474_s2 }
0x15a6   :  { %v1041_v57 = vpop.permute.xlu0 %1040 }
0x15a7   :  { %v1043_v58 = vmul.f32 %v1421_v47, %v1041_v57 }
0x15a9   :  { %1056 = vrot.lane.b32.xlu1 %v1043_v58, %s1475_s11 }
0x161b   :  { %v1057_v59 = vpop.permute.xlu1 %1056 }
0x161c   :  { %1347 = vmatmul.mubr.msk.f32.vlgmr.msra.gmra.mxu0 %vm238_vm4, %v1057_v59 }
0x16dc   :  { %v1126_v61 = vpop.f32.mrf.mxu0 }
0x16dd   :  { %v1127_v62 = vadd.f32 %v1177_v60, %v1126_v61 }
0x16de   :  { %v1348_v1 = vpop.f32.mrf.mxu0 }
0x16df   :  { %1130 = vst [vmem:[#allocation6] sm:$0xff] %v1127_v62 }
0x16e0   :  { %1455 = shalt.err (!%p1452_p9)
}
0x16e1   :  { %1140 = dma.vmem_to_hbm [thread:$0]  %s1138_s3, 128, %s1746_s5, [#allocation5]  }
0x16e2   :  { %1466 = dma.done.wait [#allocation5], 128  }
0x16e3   :  { %1467 = vsyncadd [#allocation5], 4294967168 }
0x16e4   :  { %1144 = vsyncpa [#allocation4], 1 }
0x16e5   :  { %1145 = vsyncpa [#allocation5], 1 }

</bundles_post_ra>
